<compile_context>
chip_gen: v6e
topology: v6e:2x2x1
jax: 0.10.0
libtpu: 0.0.40
codegen_flags: <defaults>
</compile_context>

<pallas_src>
import math

import jax
import jax.numpy as jnp
from jax import lax
from jax.experimental import pallas as pl
from jax.experimental.pallas import tpu as pltpu

_LANE = 128
_MAX_ROWS_PER_TILE = 512      # feature-tile rows (sublane dim) cap


def _round_up(n, m):
    return ((n + m - 1) // m) * m


def _largest_divisor_leq(n, cap):
    cap = max(1, min(n, cap))
    for d in range(cap, 0, -1):
        if n % d == 0:
            return d
    return 1


def _sublane_multiple(*dtypes):
    m = 8
    for dt in dtypes:
        itemsize = jnp.dtype(dt).itemsize
        if itemsize in (1, 2, 4):
            m = max(m, 8 * (4 // itemsize))
    return m


def _make_lif_kernel(*, decay, threshold, tt, rows_tile, sub_rows, total_steps,
                     n_valid, with_sum, row_mask_needed):
    decay = float(decay)
    threshold = float(threshold)
    n_sub = rows_tile // sub_rows
    fold = sub_rows // 8
    time_mask_needed = with_sum and (total_steps % tt != 0)
    unroll = tt if tt <= 16 else 8

    def kernel(x_ref, *rest):
        if with_sum:
            spk_ref, sum_ref, vmem_ref = rest
        else:
            spk_ref, vmem_ref = rest
            sum_ref = None

        r_tile = pl.program_id(0)
        t_chunk = pl.program_id(1)

        @pl.when(t_chunk == 0)
        def _init():
            vmem_ref[...] = jnp.zeros_like(vmem_ref)
            if with_sum:
                sum_ref[...] = jnp.zeros_like(sum_ref)

        def row_body(rs, carry_outer):
            r0 = pl.multiple_of(rs * sub_rows, sub_rows)

            # Static specialization: mask only exists when padding exists.
            if with_sum and row_mask_needed:
                base_row = r_tile * rows_tile + r0
                row_ids = lax.broadcasted_iota(jnp.int32, (sub_rows, _LANE), 0)
                lane_ids = lax.broadcasted_iota(jnp.int32, (sub_rows, _LANE), 1)
                valid_rows = (base_row + row_ids) * _LANE + lane_ids < n_valid
            else:
                valid_rows = None

            v0 = vmem_ref[pl.ds(r0, sub_rows), :]
            if with_sum:
                carry0 = (v0, jnp.zeros((8, _LANE), jnp.float32))
            else:
                carry0 = v0

            def step(i, carry):
                if with_sum:
                    v, s = carry
                else:
                    v = carry
                cur = x_ref[i, pl.ds(r0, sub_rows), :].astype(jnp.float32)
                v = v * decay + cur                       # leaky integrate
                fired = v >= threshold                    # fire
                v = jnp.where(fired, 0.0, v)              # hard reset
                out = jnp.where(fired, threshold, 0.0)    # spike * threshold
                spk_ref[i, pl.ds(r0, sub_rows), :] = out.astype(spk_ref.dtype)
                if with_sum:
                    contrib = out
                    if valid_rows is not None:
                        contrib = jnp.where(valid_rows, contrib, 0.0)
                    folded = contrib.reshape(fold, 8, _LANE).sum(axis=0)
                    if time_mask_needed:
                        folded = jnp.where(t_chunk * tt + i < total_steps,
                                           folded, 0.0)
                    s = s + folded
                    return (v, s)
                return v

            carry = lax.fori_loop(0, tt, step, carry0, unroll=unroll)
            if with_sum:
                v_fin, s_fin = carry
                sum_ref[...] += s_fin
            else:
                v_fin = carry
            vmem_ref[pl.ds(r0, sub_rows), :] = v_fin
            return carry_outer

        lax.fori_loop(0, n_sub, row_body, 0)

    return kernel


def lif_layer_forward(x, *, decay=0.2, threshold=1.0, training=True,
                      spike_dtype=None):
    """x: [T, B, ...] float. Returns (spikes with x's shape, avg_spike_rate)."""
    assert x.shape[0] > 0, "nb_steps must be > 0"
    T = x.shape[0]
    B = x.shape[1]
    feat = math.prod(x.shape[2:]) if len(x.shape) > 2 else 1
    n = B * feat

    spike_dtype = x.dtype if spike_dtype is None else jnp.dtype(spike_dtype)
    sub_mult = _sublane_multiple(x.dtype, spike_dtype)

    # Generation-aware block/VMEM budget (conservative default fits v7x 64 MiB).
    try:
        vmem_cap = pltpu.get_tpu_info().vmem_capacity_bytes
    except Exception:  # pragma: no cover - be robust to older/odd runtimes
        vmem_cap = 64 * 1024 * 1024
    if vmem_cap >= 100 * 1024 * 1024:          # v5e / v6e: 128 MiB VMEM
        max_block_rows, vmem_limit = 16384, 64 * 1024 * 1024
    else:                                      # v7x: 64 MiB per TC
        max_block_rows, vmem_limit = 8192, 32 * 1024 * 1024

    # Feature tiling: minimize padding, but give both v7x TCs work when possible.
    rows = pl.cdiv(n, _LANE)
    num_r_tiles = pl.cdiv(rows, _MAX_ROWS_PER_TILE)
    if num_r_tiles == 1 and rows >= 2 * sub_mult:
        num_r_tiles = 2
    rows_tile = _round_up(pl.cdiv(rows, num_r_tiles), sub_mult)
    rows_pad = rows_tile * num_r_tiles
    n_pad = rows_pad * _LANE
    has_pad = (n_pad != n)

    # Time chunking: as many steps per block as the VMEM budget allows; a
    # ragged tail chunk is handled with in-kernel masking (no divisor cliff).
    tt = max(1, min(T, max_block_rows // rows_tile))
    num_t_chunks = pl.cdiv(T, tt)

    # Row sub-chunk carried in vregs inside the kernel (<= 64 rows ~ 8 vregs).
    sub_cap_units = max(1, 64 // sub_mult)
    sub_rows = sub_mult * _largest_divisor_leq(rows_tile // sub_mult, sub_cap_units)

    x_flat = x.reshape(T, n)
    if has_pad:
        # TODO(synk): keep the padded (rows_pad, 128) layout end-to-end in the
        # surrounding model to avoid this copy; it only triggers for ragged n.
        x_flat = jnp.pad(x_flat, ((0, 0), (0, n_pad - n)))
    x3 = x_flat.reshape(T, rows_pad, _LANE)

    with_sum = not training
    kernel = _make_lif_kernel(
        decay=decay, threshold=threshold, tt=tt, rows_tile=rows_tile,
        sub_rows=sub_rows, total_steps=T, n_valid=n, with_sum=with_sum,
        row_mask_needed=has_pad)

    spk_spec = pl.BlockSpec((tt, rows_tile, _LANE), lambda r, t: (t, r, 0))
    spk_shape = jax.ShapeDtypeStruct((T, rows_pad, _LANE), spike_dtype)
    in_specs = [pl.BlockSpec((tt, rows_tile, _LANE), lambda r, t: (t, r, 0))]

    if with_sum:
        out_specs = [spk_spec,
                     # small per-tile sum accumulator, resident across time
                     pl.BlockSpec((8, _LANE), lambda r, t: (r, 0))]
        out_shape = (spk_shape,
                     jax.ShapeDtypeStruct((num_r_tiles * 8, _LANE), jnp.float32))
    else:
        out_specs = spk_spec
        out_shape = spk_shape

    grid_spec = pltpu.PrefetchScalarGridSpec(
        num_scalar_prefetch=0,
        grid=(num_r_tiles, num_t_chunks),
        in_specs=in_specs,
        out_specs=out_specs,
        scratch_shapes=[pltpu.VMEM((rows_tile, _LANE), jnp.float32)],
    )

    cost = pl.CostEstimate(
        flops=7 * T * n_pad,
        transcendentals=0,
        bytes_accessed=T * n_pad * (jnp.dtype(x.dtype).itemsize
                                    + jnp.dtype(spike_dtype).itemsize),
    )

    result = pl.pallas_call(
        kernel,
        out_shape=out_shape,
        grid_spec=grid_spec,
        compiler_params=pltpu.CompilerParams(
            # Feature tiles independent -> parallel (sharded across TCs on v7x);
            # time axis carries vmem/sum state -> arbitrary, trailing.
            dimension_semantics=("parallel", "arbitrary"),
            vmem_limit_bytes=vmem_limit,
        ),
        cost_estimate=cost,
    )(x3)

    if with_sum:
        spikes3, sum_blocks = result
    else:
        spikes3, sum_blocks = result, None

    spikes = spikes3.reshape(T, n_pad)
    if has_pad:
        spikes = spikes[:, :n]
    spikes = spikes.reshape((T,) + x.shape[1:])

    avg_spike_rate = None
    if with_sum:
        # record_spikes: sum over all spikes (already * threshold) / B / feat
        avg_spike_rate = jnp.sum(sum_blocks) / B / feat

    return spikes, avg_spike_rate


def _lif_reference(x, decay, threshold):
    """Pure-JAX reference for correctness checking."""
    T = x.shape[0]
    vmem = jnp.zeros_like(x[0])
    outs = []
    for t in range(T):
        vmem = vmem * decay + x[t]
        spike = (vmem >= threshold).astype(x.dtype)
        vmem = vmem * (1.0 - spike)
        outs.append(spike * threshold)
    return jnp.stack(outs)


if __name__ == "__main__":
    # Small shapes: nb_steps=8, batch=2, channels=4, spatial=16x16.
    T, B, C, H, W = 8, 2, 4, 16, 16
    key = jax.random.PRNGKey(0)
    x = jax.random.normal(key, (T, B, C, H, W), dtype=jnp.float32) * 1.5

    decay, threshold = 0.2, 1.0

    # Eval-mode variant (fused spike-rate reduction) ...
    spikes_eval, rate = lif_layer_forward(
        x, decay=decay, threshold=threshold, training=False)
    # ... and the leaner training-mode variant (no sum output).
    spikes_train, _ = lif_layer_forward(
        x, decay=decay, threshold=threshold, training=True)
    jax.block_until_ready((spikes_eval, rate, spikes_train))

    ref = _lif_reference(x, decay, threshold)
    ref_rate = jnp.sum(ref.reshape(T, B, -1)) / B / (C * H * W)

    assert spikes_eval.shape == x.shape
    assert spikes_train.shape == x.shape
    assert jnp.allclose(spikes_eval, ref, atol=1e-6), "eval spikes mismatch"
    assert jnp.allclose(spikes_train, ref, atol=1e-6), "train spikes mismatch"
    assert jnp.allclose(rate, ref_rate, atol=1e-5), "spike-rate mismatch"

    print("KERNEL_OK")
</pallas_src>

<mosaic_0001>
module attributes {stable_mosaic.version = 11 : i64} {
  func.func @kernel(%arg0: i32, %arg1: i32, %arg2: memref<8x8x128xf32, #tpu.memory_space<vmem>>, %arg3: memref<8x8x128xf32, #tpu.memory_space<vmem>>, %arg4: memref<8x128xf32, #tpu.memory_space<vmem>>, %arg5: memref<8x128xf32, #tpu.memory_space<vmem>>) attributes {dimension_semantics = [#tpu.dimension_semantics<parallel>, #tpu.dimension_semantics<arbitrary>], iteration_bounds = array<i64: 2, 1>, scalar_prefetch = 0 : i64, scratch_operands = 1 : i64, tpu.core_type = #tpu.core_type<tc>, window_params = [{transform_indices = @transform_0, window_bounds = array<i64: 8, 8, 128>}, {transform_indices = @transform_1, window_bounds = array<i64: 8, 8, 128>}, {transform_indices = @transform_2, window_bounds = array<i64: 8, 128>}]} {
    %c0_i32 = arith.constant 0 : i32
    %0 = arith.cmpi eq, %arg1, %c0_i32 : i32
    %1 = arith.extui %0 : i1 to i32
    %c0_i32_0 = arith.constant 0 : i32
    %2 = arith.cmpi ne, %1, %c0_i32_0 : i32
    scf.if %2 {
      %cst_74 = arith.constant 0.000000e+00 : f32
      %189 = vector.broadcast %cst_74 : f32 to vector<8x128xf32>
      %c0_75 = arith.constant 0 : index
      %c0_76 = arith.constant 0 : index
      %190 = vector.load %arg5[%c0_75, %c0_76] : memref<8x128xf32, #tpu.memory_space<vmem>>, vector<8x128xf32>
      tpu.vector_store %arg5[%c0_75, %c0_76], %189 {strides = array<i32>} : memref<8x128xf32, #tpu.memory_space<vmem>>, vector<8x128xf32>,
      %cst_77 = arith.constant 0.000000e+00 : f32
      %191 = vector.broadcast %cst_77 : f32 to vector<8x128xf32>
      %c0_78 = arith.constant 0 : index
      %c0_79 = arith.constant 0 : index
      %192 = vector.load %arg4[%c0_78, %c0_79] : memref<8x128xf32, #tpu.memory_space<vmem>>, vector<8x128xf32>
      tpu.vector_store %arg4[%c0_78, %c0_79], %191 {strides = array<i32>} : memref<8x128xf32, #tpu.memory_space<vmem>>, vector<8x128xf32>,
    } else {
    }
    %c0_i32_1 = arith.constant 0 : i32
    %c8_i32 = arith.constant 8 : i32
    %3 = arith.muli %c0_i32_1, %c8_i32 : i32
    %4 = tpu.assume_multiple %3, 8 : i32
    %5 = arith.index_cast %4 : i32 to index
    %c0 = arith.constant 0 : index
    %6 = vector.load %arg5[%5, %c0] : memref<8x128xf32, #tpu.memory_space<vmem>>, vector<8x128xf32>
    %cst = arith.constant 0.000000e+00 : f32
    %7 = vector.broadcast %cst : f32 to vector<8x128xf32>
    %c0_i32_2 = arith.constant 0 : i32
    %8 = arith.index_cast %c0_i32_2 : i32 to index
    %9 = arith.index_cast %4 : i32 to index
    %c0_3 = arith.constant 0 : index
    %10 = vector.load %arg2[%8, %9, %c0_3] : memref<8x8x128xf32, #tpu.memory_space<vmem>>, vector<1x8x128xf32>
    %11 = vector.shape_cast %10 : vector<1x8x128xf32> to vector<8x128xf32>
    %cst_4 = arith.constant 2.000000e-01 : f32
    %12 = vector.broadcast %cst_4 : f32 to vector<8x128xf32>
    %13 = arith.mulf %6, %12 : vector<8x128xf32>
    %14 = arith.addf %13, %11 : vector<8x128xf32>
    %cst_5 = arith.constant 1.000000e+00 : f32
    %15 = vector.broadcast %cst_5 : f32 to vector<8x128xf32>
    %16 = arith.cmpf oge, %14, %15 : vector<8x128xf32>
    %cst_6 = arith.constant 0.000000e+00 : f32
    %17 = vector.broadcast %cst_6 : f32 to vector<8x128xf32>
    %18 = arith.select %16, %17, %14 : vector<8x128xi1>, vector<8x128xf32>
    %cst_7 = arith.constant 1.000000e+00 : f32
    %cst_8 = arith.constant 0.000000e+00 : f32
    %19 = vector.broadcast %cst_7 : f32 to vector<8x128xf32>
    %20 = vector.broadcast %cst_8 : f32 to vector<8x128xf32>
    %21 = arith.select %16, %19, %20 : vector<8x128xi1>, vector<8x128xf32>
    %22 = arith.index_cast %c0_i32_2 : i32 to index
    %23 = arith.index_cast %4 : i32 to index
    %c0_9 = arith.constant 0 : index
    %24 = vector.load %arg3[%22, %23, %c0_9] : memref<8x8x128xf32, #tpu.memory_space<vmem>>, vector<1x8x128xf32>
    %25 = vector.shape_cast %24 : vector<1x8x128xf32> to vector<8x128xf32>
    %26 = vector.shape_cast %21 : vector<8x128xf32> to vector<1x8x128xf32>
    tpu.vector_store %arg3[%22, %23, %c0_9], %26 {strides = array<i32>} : memref<8x8x128xf32, #tpu.memory_space<vmem>>, vector<1x8x128xf32>,
    %27 = vector.shape_cast %21 : vector<8x128xf32> to vector<1x8x128xf32>
    %cst_10 = arith.constant dense<0.000000e+00> : vector<8x128xf32>
    %28 = vector.multi_reduction <add>, %27, %cst_10 [0] : vector<1x8x128xf32> to vector<8x128xf32>
    %29 = arith.addf %7, %28 : vector<8x128xf32>
    %c1_i32 = arith.constant 1 : i32
    %30 = arith.index_cast %c1_i32 : i32 to index
    %31 = arith.index_cast %4 : i32 to index
    %c0_11 = arith.constant 0 : index
    %32 = vector.load %arg2[%30, %31, %c0_11] : memref<8x8x128xf32, #tpu.memory_space<vmem>>, vector<1x8x128xf32>
    %33 = vector.shape_cast %32 : vector<1x8x128xf32> to vector<8x128xf32>
    %cst_12 = arith.constant 2.000000e-01 : f32
    %34 = vector.broadcast %cst_12 : f32 to vector<8x128xf32>
    %35 = arith.mulf %18, %34 : vector<8x128xf32>
    %36 = arith.addf %35, %33 : vector<8x128xf32>
    %cst_13 = arith.constant 1.000000e+00 : f32
    %37 = vector.broadcast %cst_13 : f32 to vector<8x128xf32>
    %38 = arith.cmpf oge, %36, %37 : vector<8x128xf32>
    %cst_14 = arith.constant 0.000000e+00 : f32
    %39 = vector.broadcast %cst_14 : f32 to vector<8x128xf32>
    %40 = arith.select %38, %39, %36 : vector<8x128xi1>, vector<8x128xf32>
    %cst_15 = arith.constant 1.000000e+00 : f32
    %cst_16 = arith.constant 0.000000e+00 : f32
    %41 = vector.broadcast %cst_15 : f32 to vector<8x128xf32>
    %42 = vector.broadcast %cst_16 : f32 to vector<8x128xf32>
    %43 = arith.select %38, %41, %42 : vector<8x128xi1>, vector<8x128xf32>
    %44 = arith.index_cast %c1_i32 : i32 to index
    %45 = arith.index_cast %4 : i32 to index
    %c0_17 = arith.constant 0 : index
    %46 = vector.load %arg3[%44, %45, %c0_17] : memref<8x8x128xf32, #tpu.memory_space<vmem>>, vector<1x8x128xf32>
    %47 = vector.shape_cast %46 : vector<1x8x128xf32> to vector<8x128xf32>
    %48 = vector.shape_cast %43 : vector<8x128xf32> to vector<1x8x128xf32>
    tpu.vector_store %arg3[%44, %45, %c0_17], %48 {strides = array<i32>} : memref<8x8x128xf32, #tpu.memory_space<vmem>>, vector<1x8x128xf32>,
    %49 = vector.shape_cast %43 : vector<8x128xf32> to vector<1x8x128xf32>
    %cst_18 = arith.constant dense<0.000000e+00> : vector<8x128xf32>
    %50 = vector.multi_reduction <add>, %49, %cst_18 [0] : vector<1x8x128xf32> to vector<8x128xf32>
    %51 = arith.addf %29, %50 : vector<8x128xf32>
    %c2_i32 = arith.constant 2 : i32
    %52 = arith.index_cast %c2_i32 : i32 to index
    %53 = arith.index_cast %4 : i32 to index
    %c0_19 = arith.constant 0 : index
    %54 = vector.load %arg2[%52, %53, %c0_19] : memref<8x8x128xf32, #tpu.memory_space<vmem>>, vector<1x8x128xf32>
    %55 = vector.shape_cast %54 : vector<1x8x128xf32> to vector<8x128xf32>
    %cst_20 = arith.constant 2.000000e-01 : f32
    %56 = vector.broadcast %cst_20 : f32 to vector<8x128xf32>
    %57 = arith.mulf %40, %56 : vector<8x128xf32>
    %58 = arith.addf %57, %55 : vector<8x128xf32>
    %cst_21 = arith.constant 1.000000e+00 : f32
    %59 = vector.broadcast %cst_21 : f32 to vector<8x128xf32>
    %60 = arith.cmpf oge, %58, %59 : vector<8x128xf32>
    %cst_22 = arith.constant 0.000000e+00 : f32
    %61 = vector.broadcast %cst_22 : f32 to vector<8x128xf32>
    %62 = arith.select %60, %61, %58 : vector<8x128xi1>, vector<8x128xf32>
    %cst_23 = arith.constant 1.000000e+00 : f32
    %cst_24 = arith.constant 0.000000e+00 : f32
    %63 = vector.broadcast %cst_23 : f32 to vector<8x128xf32>
    %64 = vector.broadcast %cst_24 : f32 to vector<8x128xf32>
    %65 = arith.select %60, %63, %64 : vector<8x128xi1>, vector<8x128xf32>
    %66 = arith.index_cast %c2_i32 : i32 to index
    %67 = arith.index_cast %4 : i32 to index
    %c0_25 = arith.constant 0 : index
    %68 = vector.load %arg3[%66, %67, %c0_25] : memref<8x8x128xf32, #tpu.memory_space<vmem>>, vector<1x8x128xf32>
    %69 = vector.shape_cast %68 : vector<1x8x128xf32> to vector<8x128xf32>
    %70 = vector.shape_cast %65 : vector<8x128xf32> to vector<1x8x128xf32>
    tpu.vector_store %arg3[%66, %67, %c0_25], %70 {strides = array<i32>} : memref<8x8x128xf32, #tpu.memory_space<vmem>>, vector<1x8x128xf32>,
    %71 = vector.shape_cast %65 : vector<8x128xf32> to vector<1x8x128xf32>
    %cst_26 = arith.constant dense<0.000000e+00> : vector<8x128xf32>
    %72 = vector.multi_reduction <add>, %71, %cst_26 [0] : vector<1x8x128xf32> to vector<8x128xf32>
    %73 = arith.addf %51, %72 : vector<8x128xf32>
    %c3_i32 = arith.constant 3 : i32
    %74 = arith.index_cast %c3_i32 : i32 to index
    %75 = arith.index_cast %4 : i32 to index
    %c0_27 = arith.constant 0 : index
    %76 = vector.load %arg2[%74, %75, %c0_27] : memref<8x8x128xf32, #tpu.memory_space<vmem>>, vector<1x8x128xf32>
    %77 = vector.shape_cast %76 : vector<1x8x128xf32> to vector<8x128xf32>
    %cst_28 = arith.constant 2.000000e-01 : f32
    %78 = vector.broadcast %cst_28 : f32 to vector<8x128xf32>
    %79 = arith.mulf %62, %78 : vector<8x128xf32>
    %80 = arith.addf %79, %77 : vector<8x128xf32>
    %cst_29 = arith.constant 1.000000e+00 : f32
    %81 = vector.broadcast %cst_29 : f32 to vector<8x128xf32>
    %82 = arith.cmpf oge, %80, %81 : vector<8x128xf32>
    %cst_30 = arith.constant 0.000000e+00 : f32
    %83 = vector.broadcast %cst_30 : f32 to vector<8x128xf32>
    %84 = arith.select %82, %83, %80 : vector<8x128xi1>, vector<8x128xf32>
    %cst_31 = arith.constant 1.000000e+00 : f32
    %cst_32 = arith.constant 0.000000e+00 : f32
    %85 = vector.broadcast %cst_31 : f32 to vector<8x128xf32>
    %86 = vector.broadcast %cst_32 : f32 to vector<8x128xf32>
    %87 = arith.select %82, %85, %86 : vector<8x128xi1>, vector<8x128xf32>
    %88 = arith.index_cast %c3_i32 : i32 to index
    %89 = arith.index_cast %4 : i32 to index
    %c0_33 = arith.constant 0 : index
    %90 = vector.load %arg3[%88, %89, %c0_33] : memref<8x8x128xf32, #tpu.memory_space<vmem>>, vector<1x8x128xf32>
    %91 = vector.shape_cast %90 : vector<1x8x128xf32> to vector<8x128xf32>
    %92 = vector.shape_cast %87 : vector<8x128xf32> to vector<1x8x128xf32>
    tpu.vector_store %arg3[%88, %89, %c0_33], %92 {strides = array<i32>} : memref<8x8x128xf32, #tpu.memory_space<vmem>>, vector<1x8x128xf32>,
    %93 = vector.shape_cast %87 : vector<8x128xf32> to vector<1x8x128xf32>
    %cst_34 = arith.constant dense<0.000000e+00> : vector<8x128xf32>
    %94 = vector.multi_reduction <add>, %93, %cst_34 [0] : vector<1x8x128xf32> to vector<8x128xf32>
    %95 = arith.addf %73, %94 : vector<8x128xf32>
    %c4_i32 = arith.constant 4 : i32
    %96 = arith.index_cast %c4_i32 : i32 to index
    %97 = arith.index_cast %4 : i32 to index
    %c0_35 = arith.constant 0 : index
    %98 = vector.load %arg2[%96, %97, %c0_35] : memref<8x8x128xf32, #tpu.memory_space<vmem>>, vector<1x8x128xf32>
    %99 = vector.shape_cast %98 : vector<1x8x128xf32> to vector<8x128xf32>
    %cst_36 = arith.constant 2.000000e-01 : f32
    %100 = vector.broadcast %cst_36 : f32 to vector<8x128xf32>
    %101 = arith.mulf %84, %100 : vector<8x128xf32>
    %102 = arith.addf %101, %99 : vector<8x128xf32>
    %cst_37 = arith.constant 1.000000e+00 : f32
    %103 = vector.broadcast %cst_37 : f32 to vector<8x128xf32>
    %104 = arith.cmpf oge, %102, %103 : vector<8x128xf32>
    %cst_38 = arith.constant 0.000000e+00 : f32
    %105 = vector.broadcast %cst_38 : f32 to vector<8x128xf32>
    %106 = arith.select %104, %105, %102 : vector<8x128xi1>, vector<8x128xf32>
    %cst_39 = arith.constant 1.000000e+00 : f32
    %cst_40 = arith.constant 0.000000e+00 : f32
    %107 = vector.broadcast %cst_39 : f32 to vector<8x128xf32>
    %108 = vector.broadcast %cst_40 : f32 to vector<8x128xf32>
    %109 = arith.select %104, %107, %108 : vector<8x128xi1>, vector<8x128xf32>
    %110 = arith.index_cast %c4_i32 : i32 to index
    %111 = arith.index_cast %4 : i32 to index
    %c0_41 = arith.constant 0 : index
    %112 = vector.load %arg3[%110, %111, %c0_41] : memref<8x8x128xf32, #tpu.memory_space<vmem>>, vector<1x8x128xf32>
    %113 = vector.shape_cast %112 : vector<1x8x128xf32> to vector<8x128xf32>
    %114 = vector.shape_cast %109 : vector<8x128xf32> to vector<1x8x128xf32>
    tpu.vector_store %arg3[%110, %111, %c0_41], %114 {strides = array<i32>} : memref<8x8x128xf32, #tpu.memory_space<vmem>>, vector<1x8x128xf32>,
    %115 = vector.shape_cast %109 : vector<8x128xf32> to vector<1x8x128xf32>
    %cst_42 = arith.constant dense<0.000000e+00> : vector<8x128xf32>
    %116 = vector.multi_reduction <add>, %115, %cst_42 [0] : vector<1x8x128xf32> to vector<8x128xf32>
    %117 = arith.addf %95, %116 : vector<8x128xf32>
    %c5_i32 = arith.constant 5 : i32
    %118 = arith.index_cast %c5_i32 : i32 to index
    %119 = arith.index_cast %4 : i32 to index
    %c0_43 = arith.constant 0 : index
    %120 = vector.load %arg2[%118, %119, %c0_43] : memref<8x8x128xf32, #tpu.memory_space<vmem>>, vector<1x8x128xf32>
    %121 = vector.shape_cast %120 : vector<1x8x128xf32> to vector<8x128xf32>
    %cst_44 = arith.constant 2.000000e-01 : f32
    %122 = vector.broadcast %cst_44 : f32 to vector<8x128xf32>
    %123 = arith.mulf %106, %122 : vector<8x128xf32>
    %124 = arith.addf %123, %121 : vector<8x128xf32>
    %cst_45 = arith.constant 1.000000e+00 : f32
    %125 = vector.broadcast %cst_45 : f32 to vector<8x128xf32>
    %126 = arith.cmpf oge, %124, %125 : vector<8x128xf32>
    %cst_46 = arith.constant 0.000000e+00 : f32
    %127 = vector.broadcast %cst_46 : f32 to vector<8x128xf32>
    %128 = arith.select %126, %127, %124 : vector<8x128xi1>, vector<8x128xf32>
    %cst_47 = arith.constant 1.000000e+00 : f32
    %cst_48 = arith.constant 0.000000e+00 : f32
    %129 = vector.broadcast %cst_47 : f32 to vector<8x128xf32>
    %130 = vector.broadcast %cst_48 : f32 to vector<8x128xf32>
    %131 = arith.select %126, %129, %130 : vector<8x128xi1>, vector<8x128xf32>
    %132 = arith.index_cast %c5_i32 : i32 to index
    %133 = arith.index_cast %4 : i32 to index
    %c0_49 = arith.constant 0 : index
    %134 = vector.load %arg3[%132, %133, %c0_49] : memref<8x8x128xf32, #tpu.memory_space<vmem>>, vector<1x8x128xf32>
    %135 = vector.shape_cast %134 : vector<1x8x128xf32> to vector<8x128xf32>
    %136 = vector.shape_cast %131 : vector<8x128xf32> to vector<1x8x128xf32>
    tpu.vector_store %arg3[%132, %133, %c0_49], %136 {strides = array<i32>} : memref<8x8x128xf32, #tpu.memory_space<vmem>>, vector<1x8x128xf32>,
    %137 = vector.shape_cast %131 : vector<8x128xf32> to vector<1x8x128xf32>
    %cst_50 = arith.constant dense<0.000000e+00> : vector<8x128xf32>
    %138 = vector.multi_reduction <add>, %137, %cst_50 [0] : vector<1x8x128xf32> to vector<8x128xf32>
    %139 = arith.addf %117, %138 : vector<8x128xf32>
    %c6_i32 = arith.constant 6 : i32
    %140 = arith.index_cast %c6_i32 : i32 to index
    %141 = arith.index_cast %4 : i32 to index
    %c0_51 = arith.constant 0 : index
    %142 = vector.load %arg2[%140, %141, %c0_51] : memref<8x8x128xf32, #tpu.memory_space<vmem>>, vector<1x8x128xf32>
    %143 = vector.shape_cast %142 : vector<1x8x128xf32> to vector<8x128xf32>
    %cst_52 = arith.constant 2.000000e-01 : f32
    %144 = vector.broadcast %cst_52 : f32 to vector<8x128xf32>
    %145 = arith.mulf %128, %144 : vector<8x128xf32>
    %146 = arith.addf %145, %143 : vector<8x128xf32>
    %cst_53 = arith.constant 1.000000e+00 : f32
    %147 = vector.broadcast %cst_53 : f32 to vector<8x128xf32>
    %148 = arith.cmpf oge, %146, %147 : vector<8x128xf32>
    %cst_54 = arith.constant 0.000000e+00 : f32
    %149 = vector.broadcast %cst_54 : f32 to vector<8x128xf32>
    %150 = arith.select %148, %149, %146 : vector<8x128xi1>, vector<8x128xf32>
    %cst_55 = arith.constant 1.000000e+00 : f32
    %cst_56 = arith.constant 0.000000e+00 : f32
    %151 = vector.broadcast %cst_55 : f32 to vector<8x128xf32>
    %152 = vector.broadcast %cst_56 : f32 to vector<8x128xf32>
    %153 = arith.select %148, %151, %152 : vector<8x128xi1>, vector<8x128xf32>
    %154 = arith.index_cast %c6_i32 : i32 to index
    %155 = arith.index_cast %4 : i32 to index
    %c0_57 = arith.constant 0 : index
    %156 = vector.load %arg3[%154, %155, %c0_57] : memref<8x8x128xf32, #tpu.memory_space<vmem>>, vector<1x8x128xf32>
    %157 = vector.shape_cast %156 : vector<1x8x128xf32> to vector<8x128xf32>
    %158 = vector.shape_cast %153 : vector<8x128xf32> to vector<1x8x128xf32>
    tpu.vector_store %arg3[%154, %155, %c0_57], %158 {strides = array<i32>} : memref<8x8x128xf32, #tpu.memory_space<vmem>>, vector<1x8x128xf32>,
    %159 = vector.shape_cast %153 : vector<8x128xf32> to vector<1x8x128xf32>
    %cst_58 = arith.constant dense<0.000000e+00> : vector<8x128xf32>
    %160 = vector.multi_reduction <add>, %159, %cst_58 [0] : vector<1x8x128xf32> to vector<8x128xf32>
    %161 = arith.addf %139, %160 : vector<8x128xf32>
    %c7_i32 = arith.constant 7 : i32
    %162 = arith.index_cast %c7_i32 : i32 to index
    %163 = arith.index_cast %4 : i32 to index
    %c0_59 = arith.constant 0 : index
    %164 = vector.load %arg2[%162, %163, %c0_59] : memref<8x8x128xf32, #tpu.memory_space<vmem>>, vector<1x8x128xf32>
    %165 = vector.shape_cast %164 : vector<1x8x128xf32> to vector<8x128xf32>
    %cst_60 = arith.constant 2.000000e-01 : f32
    %166 = vector.broadcast %cst_60 : f32 to vector<8x128xf32>
    %167 = arith.mulf %150, %166 : vector<8x128xf32>
    %168 = arith.addf %167, %165 : vector<8x128xf32>
    %cst_61 = arith.constant 1.000000e+00 : f32
    %169 = vector.broadcast %cst_61 : f32 to vector<8x128xf32>
    %170 = arith.cmpf oge, %168, %169 : vector<8x128xf32>
    %cst_62 = arith.constant 0.000000e+00 : f32
    %171 = vector.broadcast %cst_62 : f32 to vector<8x128xf32>
    %172 = arith.select %170, %171, %168 : vector<8x128xi1>, vector<8x128xf32>
    %cst_63 = arith.constant 1.000000e+00 : f32
    %cst_64 = arith.constant 0.000000e+00 : f32
    %173 = vector.broadcast %cst_63 : f32 to vector<8x128xf32>
    %174 = vector.broadcast %cst_64 : f32 to vector<8x128xf32>
    %175 = arith.select %170, %173, %174 : vector<8x128xi1>, vector<8x128xf32>
    %176 = arith.index_cast %c7_i32 : i32 to index
    %177 = arith.index_cast %4 : i32 to index
    %c0_65 = arith.constant 0 : index
    %178 = vector.load %arg3[%176, %177, %c0_65] : memref<8x8x128xf32, #tpu.memory_space<vmem>>, vector<1x8x128xf32>
    %179 = vector.shape_cast %178 : vector<1x8x128xf32> to vector<8x128xf32>
    %180 = vector.shape_cast %175 : vector<8x128xf32> to vector<1x8x128xf32>
    tpu.vector_store %arg3[%176, %177, %c0_65], %180 {strides = array<i32>} : memref<8x8x128xf32, #tpu.memory_space<vmem>>, vector<1x8x128xf32>,
    %181 = vector.shape_cast %175 : vector<8x128xf32> to vector<1x8x128xf32>
    %cst_66 = arith.constant dense<0.000000e+00> : vector<8x128xf32>
    %182 = vector.multi_reduction <add>, %181, %cst_66 [0] : vector<1x8x128xf32> to vector<8x128xf32>
    %183 = arith.addf %161, %182 : vector<8x128xf32>
    %c8_i32_67 = arith.constant 8 : i32
    %c0_68 = arith.constant 0 : index
    %c0_69 = arith.constant 0 : index
    %184 = vector.load %arg4[%c0_68, %c0_69] : memref<8x128xf32, #tpu.memory_space<vmem>>, vector<8x128xf32>
    %185 = arith.addf %184, %183 : vector<8x128xf32>
    %c0_70 = arith.constant 0 : index
    %c0_71 = arith.constant 0 : index
    %186 = vector.load %arg4[%c0_70, %c0_71] : memref<8x128xf32, #tpu.memory_space<vmem>>, vector<8x128xf32>
    tpu.vector_store %arg4[%c0_70, %c0_71], %185 {strides = array<i32>} : memref<8x128xf32, #tpu.memory_space<vmem>>, vector<8x128xf32>,
    %187 = arith.index_cast %4 : i32 to index
    %c0_72 = arith.constant 0 : index
    %188 = vector.load %arg5[%187, %c0_72] : memref<8x128xf32, #tpu.memory_space<vmem>>, vector<8x128xf32>
    tpu.vector_store %arg5[%187, %c0_72], %172 {strides = array<i32>} : memref<8x128xf32, #tpu.memory_space<vmem>>, vector<8x128xf32>,
    %c1_i32_73 = arith.constant 1 : i32
    return
  }
  func.func @transform_0(%arg0: i32, %arg1: i32) -> (i32, i32, i32) {
    %c0_i32 = arith.constant 0 : i32
    %c0_i32_0 = arith.constant 0 : i32
    return %arg1, %arg0, %c0_i32 : i32, i32, i32
  }
  func.func @transform_1(%arg0: i32, %arg1: i32) -> (i32, i32, i32) {
    %c0_i32 = arith.constant 0 : i32
    %c0_i32_0 = arith.constant 0 : i32
    return %arg1, %arg0, %c0_i32 : i32, i32, i32
  }
  func.func @transform_2(%arg0: i32, %arg1: i32) -> (i32, i32) {
    %c0_i32 = arith.constant 0 : i32
    %c0_i32_0 = arith.constant 0 : i32
    return %arg0, %c0_i32 : i32, i32
  }
}

</mosaic_0001>

<bundles_post_ra>
// kernel: tpu_custom_call.1
= control target key start
LH: loop header
LB: loop body
LE: loop exit
PB: predicated region body
PF: predicated region fallthrough
CT: control target
= control target key end

     0   :  { %8 = vsyncpa [#allocation4], 0  ;;  %s923_s0 = inlined_call_operand.hbm [shape: f32[8,16,128], index: 0, kind: input, shape index: {}]   ;;  %s924_s1 = inlined_call_operand.hbm [shape: f32[8,16,128], index: 1, kind: output, shape index: {0}]   ;;  %s925_s2 = inlined_call_operand.hbm [shape: f32[16,128], index: 2, kind: output, shape index: {1}]  }
   0x1   :  { %10 = vsyncpa [#allocation4 + $0x1], 0 }
   0x2   :  { %11 = vsyncpa [#allocation5], 0 }
   0x3   :  { %13 = vsyncpa [#allocation5 + $0x1], 0 }
   0x4   :  { %14 = vsyncpa [#allocation8], 0 }
   0x5   :  { %16 = vsyncpa [#allocation8 + $0x1], 0  ;;  %s731_s9 = smov 0   ;;  %s733_s10 = smov 0  }
   0x6   :  { %s735_s11 = smov 0   ;;  %s737_s12 = smov 0  }
   0x7   :  { %s739_s13 = smov 0   ;;  %s741_s14 = smov 0  }
   0x8 LB: > { %s462_s15 = sadd.s32 4294967295, %s704_s14   ;;  %s463_s16 = sadd.s32 4294967294, %s704_s14   ;;  %s704_s14 = sphi %s741_s14, %s22_s14   ;;  %s700_s13 = sphi %s739_s13, %s936_s13   ;;  %s696_s12 = sphi %s737_s12, %s935_s12   ;;  %s692_s11 = sphi %s735_s11, %s934_s11   ;;  %s688_s10 = sphi %s733_s10, %s933_s10   ;;  %s684_s9 = sphi %s731_s9, %s932_s9  }
   0x9   : > { %s34_s17 = sadd.s32 1, %s700_s13  ;;  %s43_s18 = sadd.s32 1, %s692_s11 }
   0xa   : > { %p36_p0 = scmp.ge.s32.totalorder %s34_s17, 2  ;;  %p50_p1 = scmp.ne.s32.totalorder %s692_s11, %s688_s10 }
   0xb   : > { %p51_p2 = scmp.eq.s32.totalorder %s704_s14, 0  ;;  %p56_p3 = scmp.ne.s32.totalorder %s688_s10, %s684_s9 }
   0xc   : > { %s938_s17 = smov (%p36_p0, %s34_s17), 0  ;;  %p57_p5 = scmp.eq.s32.totalorder %s462_s15, 0 }
   0xd   : > { %p772_p4 = por %p51_p2, %p50_p1  ;;  %s39_s20 = ssub.s32 %s700_s13, %s938_s17 }
   0xe   : > { %p82_p6 = scmp.eq.s32.totalorder %s462_s15, 1  ;;  %p41_p7 = scmp.eq.s32.totalorder %s39_s20, 0 }
   0xf   : > { %p778_p8 = por %p57_p5, %p56_p3  ;;  %p88_p10 = scmp.eq.s32.totalorder %s463_s16, 1 }
  0x10   : > { %p782_p9 = por %p82_p6, %p50_p1  ;;  %p509_p13 = scmp.lt.s32.totalorder %s704_s14, 2 }
  0x11   : > { %s787_s23 = scalar_select %p41_p7, %s692_s11, %s43_s18  }
  0x12   : > { %p789_p11 = por %p88_p10, %p56_p3  ;;  %s134_s25 = sand.u32 1, %s692_s11  }
  0x13   : > { %s466_s26 = sshll.u32 %s134_s25, 6  ;;  %s467_s27 = sshll.u32 %s700_s13, 7 }
  0x14   : > { %s146_s30 = scalar_lea.hbm %s923_s0, %s467_s27  ;;  %s138_s3 = scalar_lea.vmem [#allocation3], %s466_s26 }
  0x15   : > { %s147_s4 = sshll.u32 %s138_s3, 4  ;;  %p802_p0 = pnand %p509_p13, %p772_p4  ;;  %s148_s4 = int_to_ptr.vmem [resolvable:$true] %s147_s4 }
  0x16   : > { %s135_s6 = scalar_lea.sflag [#allocation4], %s134_s25  ;;  %s579_s7 = scalar_lea.vmem %s148_s4, 1024 }
  0x17   : > { %p568_p1 = pneg %p802_p0  ;;  %p580_p2 = scmp.ne.s32.totalorder %s148_s4, %s579_s7 }
  0x18   : > { %s706_s8 = smov [#allocation3]  }
  0x19   : > { %p582_p3 = pnand %p580_p2, %p568_p1  ;;  %s584_s15 = sshll.u32 %s706_s8, 4  ;;  %s585_s15 = int_to_ptr.vmem [resolvable:$false] %s584_s15 }
  0x1a   : > { %s586_s16 = scalar_lea.vmem %s585_s15, 2048  ;;  %p587_p6 = scmp.lt.s32.totalorder %s148_s4, %s585_s15 }
  0x1b   : > { %p583_p5 = pneg %p582_p3  ;;  %p588_p7 = scmp.lt.s32.totalorder %s586_s16, %s579_s7 }
  0x1d   : > { %p589_p10 = por %p588_p7, %p587_p6 }
  0x1f   : > { %p590_p12 = pnand %p589_p10, %p583_p5 }
  0x21   : > { %593 = shalt.err (!%p590_p12)
}
  0x22   : > { %s707_s18 = smov 256   ;;  %s708_s19 = smov 128  }
  0x23   : > { %s709_s20 = smov 8   ;;  %p468_p4 = scmp.ge.s32.totalorder %s704_s14, 1 }
  0x24   : > { %501 = dma.hbm_to_vmem [thread:$0]  (!%p802_p0), %s146_s30, 1024, %s148_s4, %s135_s6, %s707_s18, %s708_s19, %s709_s20  }
  0x25   : > { %p155_p13 = scmp.lt.s32.totalorder %s704_s14, 3 }
  0x27   : > { %p156_p1 = pnand %p468_p4, %p155_p13 }
  0x28   : > { %s813_s25 = sand.u32 (!%p156_p1), 1, %s688_s10  }
  0x29   : > { %159 = sbr.rel (%p156_p1) target bundleno = 129 (0x81), region = 24  ;;  %s469_s26 = sshll.u32 (!%p156_p1), %s813_s25, 6 }
  0x2a   : > { %s162_s27 = scalar_lea.sflag (!%p156_p1), [#allocation4], %s813_s25  ;;  %s817_s28 = scalar_lea.vmem (!%p156_p1), [#allocation3], %s469_s26 }
  0x2e   : > { %671 = dma.done.wait (%p778_p8), %s162_s27, 1024  }
  0x2f   : > { %673 = vsyncadd (%p778_p8), %s162_s27, 4294966272  ;;  %v200_v0 = vld [vmem:[%s817_s28] sm:$0xff]  ;;  %v710_v2 = vmov 0.0   ;;  %v472_v4 = vld [vmem:[%s817_s28 + $0x8] sm:$0xff]  ;;  %s825_s29 = scalar_lea.vmem [#allocation6], %s469_s26  ;;  %s471_s21 = sshll.u32 %s813_s25, 3 }
  0x30   : > { %vm203_vm0 = vcmp.ge.f32.partialorder %v200_v0, 1.0  ;;  %v474_v9 = vld [vmem:[%s817_s28 + $0x10] sm:$0xff]  ;;  %v476_v14 = vld [vmem:[%s817_s28 + $0x18] sm:$0xff]  ;;  %v478_v19 = vld [vmem:[%s817_s28 + $0x20] sm:$0xff]  ;;  %s318_s30 = sshll.u32 %s825_s29, 4  ;;  %s488_s3 = sshll.u32 %s696_s12, 7  ;;  %s843_s30 = int_to_ptr.vmem [resolvable:$true] %s318_s30 }
  0x31   : > { %v204_v1 = vsel %vm203_vm0, 0.0, %v200_v0  ;;  %v205_v3 = vsel %vm203_vm0, 1.0, %v710_v2  ;;  %v480_v26 = vld [vmem:[%s817_s28 + $0x28] sm:$0xff]  ;;  %v482_v32 = vld [vmem:[%s817_s28 + $0x30] sm:$0xff]  ;;  %v484_v39 = vld [vmem:[%s817_s28 + $0x38] sm:$0xff]  ;;  %s850_s6 = scalar_lea.hbm %s924_s1, %s488_s3  ;;  %s852_s7 = scalar_lea.vmem [#allocation7], %s471_s21 }
  0x32   : > { %206 = vst [vmem:[%s825_s29] sm:$0xff] %v205_v3  ;;  %v212_v5 = vmul.f32 0.2, %v204_v1  ;;  %s334_s8 = sshll.u32 %s852_s7, 4  ;;  %s298_s15 = scalar_lea.sflag [#allocation5], %s813_s25  ;;  %s335_s8 = int_to_ptr.vmem [resolvable:$true] %s334_s8 }
  0x33   : > { %s594_s16 = scalar_lea.vmem %s843_s30, 1024  ;;  %s711_s18 = smov [#allocation6]  }
  0x34   : > { %v213_v6 = vadd.f32 %v472_v4, %v212_v5  ;;  %p595_p8 = scmp.ne.s32.totalorder %s843_s30, %s594_s16  ;;  %s598_s19 = sshll.u32 %s711_s18, 4  ;;  %s599_s19 = int_to_ptr.vmem [resolvable:$false] %s598_s19 }
  0x35   : > { %s600_s20 = scalar_lea.vmem %s599_s19, 2048  ;;  %p601_p2 = scmp.lt.s32.totalorder %s843_s30, %s599_s19 }
  0x36   : > { %vm214_vm1 = vcmp.ge.f32.partialorder %v213_v6, 1.0  ;;  %p596_p12 = pnand %p595_p8, %p782_p9  ;;  %p602_p3 = scmp.lt.s32.totalorder %s600_s20, %s594_s16 }
  0x37   : > { %v215_v7 = vsel %vm214_vm1, 0.0, %v213_v6  ;;  %v216_v8 = vsel %vm214_vm1, 1.0, %v710_v2 }
  0x38   : > { %473 = vst [vmem:[%s825_s29 + $0x8] sm:$0xff] %v216_v8  ;;  %v224_v10 = vmul.f32 0.2, %v215_v7  ;;  %v220_v20 = vadd.f32 %v216_v8, %v205_v3  ;;  %p597_p0 = pneg %p596_p12  ;;  %p603_p5 = por %p602_p3, %p601_p2 }
  0x3a   : > { %v225_v11 = vadd.f32 %v474_v9, %v224_v10  ;;  %p604_p6 = pnand %p603_p5, %p597_p0 }
  0x3c   : > { %vm226_vm2 = vcmp.ge.f32.partialorder %v225_v11, 1.0 }
  0x3d   : > { %v227_v12 = vsel %vm226_vm2, 0.0, %v225_v11  ;;  %v228_v13 = vsel %vm226_vm2, 1.0, %v710_v2 }
  0x3e   : > { %475 = vst [vmem:[%s825_s29 + $0x10] sm:$0xff] %v228_v13  ;;  %v236_v15 = vmul.f32 0.2, %v227_v12  ;;  %v232_v23 = vadd.f32 %v228_v13, %v220_v20 }
  0x40   : > { %v237_v16 = vadd.f32 %v476_v14, %v236_v15 }
  0x42   : > { %vm238_vm3 = vcmp.ge.f32.partialorder %v237_v16, 1.0 }
  0x43   : > { %v239_v17 = vsel %vm238_vm3, 0.0, %v237_v16  ;;  %v240_v18 = vsel %vm238_vm3, 1.0, %v710_v2 }
  0x44   : > { %477 = vst [vmem:[%s825_s29 + $0x18] sm:$0xff] %v240_v18  ;;  %v248_v21 = vmul.f32 0.2, %v239_v17  ;;  %v244_v28 = vadd.f32 %v240_v18, %v232_v23 }
  0x46   : > { %v249_v22 = vadd.f32 %v478_v19, %v248_v21 }
  0x48   : > { %vm250_vm4 = vcmp.ge.f32.partialorder %v249_v22, 1.0 }
  0x49   : > { %v251_v24 = vsel %vm250_vm4, 0.0, %v249_v22  ;;  %v252_v25 = vsel %vm250_vm4, 1.0, %v710_v2 }
  0x4a   : > { %479 = vst [vmem:[%s825_s29 + $0x20] sm:$0xff] %v252_v25  ;;  %v260_v27 = vmul.f32 0.2, %v251_v24  ;;  %v256_v33 = vadd.f32 %v252_v25, %v244_v28 }
  0x4c   : > { %v261_v29 = vadd.f32 %v480_v26, %v260_v27 }
  0x4e   : > { %vm262_vm5 = vcmp.ge.f32.partialorder %v261_v29, 1.0 }
  0x4f   : > { %v263_v30 = vsel %vm262_vm5, 0.0, %v261_v29  ;;  %v264_v31 = vsel %vm262_vm5, 1.0, %v710_v2 }
  0x50   : > { %481 = vst [vmem:[%s825_s29 + $0x28] sm:$0xff] %v264_v31  ;;  %v272_v34 = vmul.f32 0.2, %v263_v30  ;;  %v268_v36 = vadd.f32 %v264_v31, %v256_v33 }
  0x52   : > { %v273_v35 = vadd.f32 %v482_v32, %v272_v34 }
  0x54   : > { %vm274_vm6 = vcmp.ge.f32.partialorder %v273_v35, 1.0 }
  0x55   : > { %v275_v37 = vsel %vm274_vm6, 0.0, %v273_v35  ;;  %v276_v38 = vsel %vm274_vm6, 1.0, %v710_v2 }
  0x56   : > { %483 = vst [vmem:[%s825_s29 + $0x30] sm:$0xff] %v276_v38  ;;  %v284_v40 = vmul.f32 0.2, %v275_v37  ;;  %v280_v41 = vadd.f32 %v276_v38, %v268_v36 }
  0x58   : > { %v285_v42 = vadd.f32 %v484_v39, %v284_v40 }
  0x5a   : > { %vm286_vm7 = vcmp.ge.f32.partialorder %v285_v42, 1.0 }
  0x5b   : > { %v288_v43 = vsel %vm286_vm7, 1.0, %v710_v2 }
  0x5c   : > { %485 = vst [vmem:[%s825_s29 + $0x38] sm:$0xff] %v288_v43  ;;  %v292_v44 = vadd.f32 %v288_v43, %v280_v41 }
  0x5d   : > { %607 = shalt.err (!%p604_p6)
}
  0x5e   : > { %s608_s26 = scalar_lea.hbm %s850_s6, 1024  ;;  %s612_s29 = scalar_lea.hbm %s924_s1, 2048 }
  0x5f   : > { %p609_p7 = scmp.ne.s32.totalorder %s850_s6, %s608_s26  ;;  %p613_p13 = scmp.lt.s32.totalorder %s850_s6, %s924_s1 }
  0x60   : > { %p614_p1 = scmp.lt.s32.totalorder %s612_s29, %s608_s26 }
  0x61   : > { %p610_p10 = pnand %p609_p7, %p782_p9 }
  0x62   : > { %p615_p8 = por %p614_p1, %p613_p13 }
  0x63   : > { %p611_p4 = pneg %p610_p10 }
  0x65   : > { %p616_p12 = pnand %p615_p8, %p611_p4 }
  0x67   : > { %619 = shalt.err (!%p616_p12)
}
  0x68   : > { %s712_s5 = smov 128   ;;  %s713_s16 = smov 256   ;;  %295 = vst [vmem:[%s852_s7] sm:$0xff] %v292_v44 }
  0x69   : > { %s714_s18 = smov 8   ;;  %s332_s26 = scalar_lea.hbm %s925_s2, %s488_s3 }
  0x6a   : > { %494 = dma.vmem_to_hbm [thread:$0]  (%p782_p9), %s843_s30, 1024, %s850_s6, %s298_s15, %s712_s5, %s713_s16, %s714_s18  }
  0x6b   : > { %s303_s27 = scalar_lea.sflag [#allocation8], %s813_s25  ;;  %s620_s28 = scalar_lea.vmem %s335_s8, 128 }
  0x6c   : > { %p621_p0 = scmp.ne.s32.totalorder %s335_s8, %s620_s28  ;;  %s715_s29 = smov [#allocation7]  }
  0x6d   : > { %s624_s21 = sshll.u32 %s715_s29, 4  ;;  %s625_s21 = int_to_ptr.vmem [resolvable:$false] %s624_s21 }
  0x6e   : > { %p622_p2 = pnand %p621_p0, %p782_p9  ;;  %s626_s4 = scalar_lea.vmem %s625_s21, 256 }
  0x6f   : > { %p627_p5 = scmp.lt.s32.totalorder %s335_s8, %s625_s21  ;;  %p628_p6 = scmp.lt.s32.totalorder %s626_s4, %s620_s28 }
  0x70   : > { %p623_p3 = pneg %p622_p2 }
  0x71   : > { %p629_p7 = por %p628_p6, %p627_p5 }
  0x73   : > { %p630_p10 = pnand %p629_p7, %p623_p3 }
  0x75   : > { %633 = shalt.err (!%p630_p10)
}
  0x76   : > { %s634_s12 = scalar_lea.hbm %s332_s26, 128  ;;  %s638_s3 = scalar_lea.hbm %s925_s2, 256 }
  0x77   : > { %p635_p4 = scmp.ne.s32.totalorder %s332_s26, %s634_s12  ;;  %p639_p8 = scmp.lt.s32.totalorder %s332_s26, %s925_s2 }
  0x78   : > { %p640_p12 = scmp.lt.s32.totalorder %s638_s3, %s634_s12 }
  0x79   : > { %p636_p13 = pnand %p635_p4, %p782_p9 }
  0x7a   : > { %p641_p0 = por %p640_p12, %p639_p8 }
  0x7b   : > { %p637_p1 = pneg %p636_p13 }
  0x7d   : > { %p642_p2 = pnand %p641_p0, %p637_p1 }
  0x7f   : > { %645 = shalt.err (!%p642_p2)
}
  0x80   : > { %495 = dma.vmem_to_hbm [thread:$0]  (%p782_p9), %s335_s8, 128, %s332_s26, %s303_s27  }
  0x81 PF: > { %s346_s15 = sand.u32 1, %s684_s9   ;;  %p931_p3 = scmp.ge.s32.totalorder %s704_s14, 2 }
  0x82   : > { %s347_s5 = scalar_lea.sflag [#allocation5], %s346_s15 }
  0x83   : > { %p503_p5 = pnand %p931_p3, %p789_p11 }
  0x85   : > { %p504_p6 = pneg %p503_p5 }
  0x87   : > { %675 = dma.done.wait (%p504_p6), %s347_s5, 1024  }
  0x88   : > { %677 = vsyncadd (%p504_p6), %s347_s5, 4294966272  ;;  %s356_s16 = scalar_lea.sflag [#allocation8], %s346_s15 }
  0x89   : > { %679 = dma.done.wait (%p504_p6), %s356_s16, 128  }
  0x8a   : > { %681 = vsyncadd (%p504_p6), %s356_s16, 4294967168  ;;  %s22_s14 = sadd.s32 1, %s704_s14   ;;  %s932_s9 = smov %s688_s10 }
  0x8b   : > { %p19_p7 = scmp.ge.s32.totalorder %s22_s14, 4   ;;  %s933_s10 = smov %s692_s11 }
  0x8c   : > { %s934_s11 = smov %s787_s23  ;;  %s935_s12 = smov %s700_s13 }
  0x8d   : > { %s936_s13 = smov %s938_s17  ;;  %21 = sbr.rel (!%p19_p7) target bundleno = 8 (0x8), region = 104 }
  0x92   :  { %361 = vsyncpa [#allocation4], 1 }
  0x93   :  { %363 = vsyncpa [#allocation4 + $0x1], 1 }
  0x94   :  { %364 = vsyncpa [#allocation5], 1 }
  0x95   :  { %366 = vsyncpa [#allocation5 + $0x1], 1 }
  0x96   :  { %367 = vsyncpa [#allocation8], 1 }
  0x97   :  { %369 = vsyncpa [#allocation8 + $0x1], 1 }

</bundles_post_ra>
